<compile_context>
chip_gen: v7x
topology: tpu7x:2x2x1
jax: 0.10.0
libtpu: 0.0.40
codegen_flags: <defaults>
</compile_context>

<pallas_src>
import jax
import jax.numpy as jnp
import numpy as np
from jax import lax
from jax.experimental import pallas as pl
from jax.experimental.pallas import tpu as pltpu

EPS = 1e-5


# -----------------------------------------------------------------------------
# Host-side constant builders
# -----------------------------------------------------------------------------
def _make_tap_masks(H, W, NT):
    """(9, NT*HW) 0/1 masks.  mask[t, q]==1 iff the 3x3 tap t=(ky,kx) reads an
    in-bounds pixel at flattened position q (zero-padding elsewhere)."""
    HW = H * W
    m = np.zeros((9, HW), np.float32)
    for ky in range(3):
        for kx in range(3):
            t = ky * 3 + kx
            dy, dx = ky - 1, kx - 1
            for h in range(H):
                for w in range(W):
                    if 0 <= h + dy < H and 0 <= w + dx < W:
                        m[t, h * W + w] = 1.0
    return np.tile(m, (1, NT))


def _make_pool_mat(HW, NT):
    """(NT*HW, NT): right-multiplying (C, L) activations gives per-image GAP."""
    p = np.zeros((NT * HW, NT), np.float32)
    for n in range(NT):
        p[n * HW:(n + 1) * HW, n] = 1.0 / HW
    return p


def _make_sel_mat(HW, NT):
    """(NT, NT*HW) 0/1 selector: broadcasts a per-image gate back to its lanes."""
    s = np.zeros((NT, NT * HW), np.float32)
    for n in range(NT):
        s[n, n * HW:(n + 1) * HW] = 1.0
    return s


def _pick_nt(N, per_image_bytes, target_bytes):
    """Images per grid step: grow toward target_bytes but keep >=2 grid steps."""
    cap = max(1, target_bytes // per_image_bytes)
    if N >= 2:
        cap = min(cap, N // 2)      # keep a >=2-way parallel grid (v7x: 2 TensorCores)
    nt = 1
    for d in range(1, N + 1):
        if d <= cap and N % d == 0:
            nt = d
    return nt


# -----------------------------------------------------------------------------
# Kernel
# -----------------------------------------------------------------------------
def _make_kernel(C, Cr, H, W, NT):
    HW = H * W
    L = NT * HW
    # Tap (ky,kx) reads x[h+ky-1, w+kx-1]; on the flattened lane axis that is a
    # circular roll by -( (ky-1)*W + (kx-1) ) with wrapped positions masked to zero.
    roll_amounts = []
    for ky in range(3):
        for kx in range(3):
            s = (ky - 1) * W + (kx - 1)
            roll_amounts.append((-s) % L)

    def kernel(x_ref, m_ref, w1_ref, w2_ref, bn_ref, d1_ref, d2_ref,
               p_ref, s_ref, out_ref):
        x = x_ref[...]                              # (C, L) f32, lane-dense
        masks = m_ref[...]                          # (9, L) f32 (0/1)
        bn = bn_ref[...]                            # (C, 2) f32 additive BN shifts

        def conv3x3_bn(inp, w_ref, shift_col):
            # Build the (9C, L) shifted/masked tap stack (rolls = XLU, masks = VPU),
            # then a single bf16 MXU matmul with K = 9C and f32 accumulation.
            taps = []
            for t in range(9):
                a = roll_amounts[t]
                rolled = inp if a == 0 else pltpu.roll(inp, a, axis=1)
                taps.append(rolled * masks[t:t + 1])
            stack = jnp.concatenate(taps, axis=0).astype(jnp.bfloat16)   # (9C, L)
            acc = jnp.dot(w_ref[...], stack,
                          preferred_element_type=jnp.float32)            # (C, L) f32
            return acc + bn[:, shift_col:shift_col + 1]

        def sigmoid(v):                              # stable, EUP tanh path
            return 0.5 * (jnp.tanh(0.5 * v) + 1.0)

        # conv1 -> BN1 (scale folded into weights) -> ReLU
        h = jnp.maximum(conv3x3_bn(x, w1_ref, 0), 0.0)
        # conv2 -> BN2 (scale folded into weights)
        o = conv3x3_bn(h, w2_ref, 1)

        # DWA gate: GAP -> FC(C->Cr) -> ReLU -> FC(Cr->C) -> sigmoid  (all f32, tiny)
        if NT == 1:
            pooled = jnp.mean(o, axis=1, keepdims=True)                    # (C, 1)
        else:
            pooled = jnp.dot(o, p_ref[...],
                             preferred_element_type=jnp.float32)           # (C, NT)
        g = jnp.maximum(jnp.dot(d1_ref[...], pooled,
                                preferred_element_type=jnp.float32), 0.0)  # (Cr, NT)
        gate = sigmoid(jnp.dot(d2_ref[...], g,
                               preferred_element_type=jnp.float32))        # (C, NT)
        if NT == 1:
            gate_full = gate                                               # broadcast
        else:
            gate_full = jnp.dot(gate, s_ref[...],
                                preferred_element_type=jnp.float32)        # (C, L)

        # gate, identity residual (downsample=None), final ReLU
        out_ref[...] = jnp.maximum(o * gate_full + x, 0.0)

    return kernel


# -----------------------------------------------------------------------------
# Wrapper
# -----------------------------------------------------------------------------
def basic_block_dwa_forward(x, p, target_step_bytes=2 << 20):
    N, C, H, W = x.shape
    HW = H * W
    Cr = p["dwa_w1"].shape[0]
    assert p["conv1_w"].shape[:2] == (C, C), (
        "only the inplanes == planes, stride=1, downsample=None path is implemented")

    NT = _pick_nt(N, C * HW * 4, target_step_bytes)   # images per grid step
    NG = N // NT
    L = NT * HW

    # Fold BatchNorm (inference / running-stats) scale into conv weights; keep shift.
    s1 = p["bn1_gamma"] * lax.rsqrt(p["bn1_var"] + EPS)
    b1 = p["bn1_beta"] - p["bn1_mean"] * s1
    s2 = p["bn2_gamma"] * lax.rsqrt(p["bn2_var"] + EPS)
    b2 = p["bn2_beta"] - p["bn2_mean"] * s2
    bnshift = jnp.stack([b1, b2], axis=1).astype(jnp.float32)            # (C, 2)

    w1f = p["conv1_w"] * s1[:, None, None, None]
    w2f = p["conv2_w"] * s2[:, None, None, None]
    # (C_out, 9*C_in) with column index t*C + c_in, t = ky*3 + kx  (matches tap stack)
    w1cat = jnp.transpose(w1f, (0, 2, 3, 1)).reshape(C, 9 * C).astype(jnp.bfloat16)
    w2cat = jnp.transpose(w2f, (0, 2, 3, 1)).reshape(C, 9 * C).astype(jnp.bfloat16)

    masks = jnp.asarray(_make_tap_masks(H, W, NT))                        # (9, L)
    pool = jnp.asarray(_make_pool_mat(HW, NT))                            # (L, NT)
    sel = jnp.asarray(_make_sel_mat(HW, NT))                              # (NT, L)

    # Lane-dense layout: (NG, C, NT*HW); images of a group are contiguous lane blocks.
    xg = (x.astype(jnp.float32)
           .reshape(NG, NT, C, HW).transpose(0, 2, 1, 3).reshape(NG, C, L))

    out = pl.pallas_call(
        _make_kernel(C, Cr, H, W, NT),
        grid=(NG,),
        in_specs=[
            pl.BlockSpec((None, C, L), lambda i: (i, 0, 0)),   # x (lane-dense)
            pl.BlockSpec((9, L), lambda i: (0, 0)),            # tap border masks
            pl.BlockSpec((C, 9 * C), lambda i: (0, 0)),        # conv1 taps (bf16, BN folded)
            pl.BlockSpec((C, 9 * C), lambda i: (0, 0)),        # conv2 taps (bf16, BN folded)
            pl.BlockSpec((C, 2), lambda i: (0, 0)),            # BN additive shifts
            pl.BlockSpec((Cr, C), lambda i: (0, 0)),           # DWA fc1
            pl.BlockSpec((C, Cr), lambda i: (0, 0)),           # DWA fc2
            pl.BlockSpec((L, NT), lambda i: (0, 0)),           # per-image GAP matrix
            pl.BlockSpec((NT, L), lambda i: (0, 0)),           # per-image gate selector
        ],
        out_specs=pl.BlockSpec((None, C, L), lambda i: (i, 0, 0)),
        out_shape=jax.ShapeDtypeStruct((NG, C, L), jnp.float32),
        compiler_params=pltpu.CompilerParams(dimension_semantics=("parallel",)),
    )(xg, masks, w1cat, w2cat, bnshift,
      p["dwa_w1"].astype(jnp.float32), p["dwa_w2"].astype(jnp.float32), pool, sel)

    return (out.reshape(NG, C, NT, HW).transpose(0, 2, 1, 3).reshape(N, C, H, W))


# -----------------------------------------------------------------------------
# Deterministic parameter init (shapes from BasicBlockWithDWA / DWA block)
# -----------------------------------------------------------------------------
def init_params(key, C, reduction=4):
    Cr = max(C // reduction, 1)
    ks = jax.random.split(key, 12)

    def nrm(k, shape, scale=0.1):
        return scale * jax.random.normal(k, shape, jnp.float32)

    return {
        "conv1_w": nrm(ks[0], (C, C, 3, 3)),
        "conv2_w": nrm(ks[1], (C, C, 3, 3)),
        "bn1_gamma": 1.0 + nrm(ks[2], (C,)),
        "bn1_beta": nrm(ks[3], (C,)),
        "bn1_mean": nrm(ks[4], (C,)),
        "bn1_var": 1.0 + 0.5 * jnp.abs(jax.random.normal(ks[5], (C,), jnp.float32)),
        "bn2_gamma": 1.0 + nrm(ks[6], (C,)),
        "bn2_beta": nrm(ks[7], (C,)),
        "bn2_mean": nrm(ks[8], (C,)),
        "bn2_var": 1.0 + 0.5 * jnp.abs(jax.random.normal(ks[9], (C,), jnp.float32)),
        "dwa_w1": nrm(ks[10], (Cr, C)),     # Linear(C -> C//4, bias=False)
        "dwa_w2": nrm(ks[11], (C, Cr)),     # Linear(C//4 -> C, bias=False)
    }


# -----------------------------------------------------------------------------
# Pure-JAX f32 reference (mirrors BasicBlockWithDWA.forward with inference-mode BN)
# -----------------------------------------------------------------------------
def ref_forward(x, p):
    dn = ("NCHW", "OIHW", "NCHW")

    def bn(t, g, b, m, v):
        return (g[None, :, None, None] * (t - m[None, :, None, None])
                * lax.rsqrt(v[None, :, None, None] + EPS) + b[None, :, None, None])

    out = lax.conv_general_dilated(x, p["conv1_w"], (1, 1), [(1, 1), (1, 1)],
                                   dimension_numbers=dn)
    out = jnp.maximum(bn(out, p["bn1_gamma"], p["bn1_beta"],
                         p["bn1_mean"], p["bn1_var"]), 0.0)
    out = lax.conv_general_dilated(out, p["conv2_w"], (1, 1), [(1, 1), (1, 1)],
                                   dimension_numbers=dn)
    out = bn(out, p["bn2_gamma"], p["bn2_beta"], p["bn2_mean"], p["bn2_var"])
    # DWA: global avg pool -> fc -> ReLU -> fc -> sigmoid -> channel gate
    y = jnp.mean(out, axis=(2, 3))                       # (N, C)
    y = jnp.maximum(y @ p["dwa_w1"].T, 0.0)              # (N, Cr)
    y = jax.nn.sigmoid(y @ p["dwa_w2"].T)                # (N, C)
    out = out * y[:, :, None, None]
    out = out + x                                        # downsample=None
    return jnp.maximum(out, 0.0)


if __name__ == "__main__":
    key = jax.random.PRNGKey(0)
    kx_, kp = jax.random.split(key)
    N, C, H, W = 2, 16, 16, 16
    x = jax.random.normal(kx_, (N, C, H, W), jnp.float32)
    params = init_params(kp, C)

    out = jax.jit(basic_block_dwa_forward)(x, params)
    out = jax.block_until_ready(out)

    ref = ref_forward(x, params)
    err = float(jnp.max(jnp.abs(out - ref)))
    assert out.shape == (N, C, H, W)
    assert np.isfinite(np.asarray(out)).all()
    # MXU operands are bf16 (per perf review) with f32 accumulation -> relax tolerance.
    assert err < 3e-2, f"max abs error vs f32 reference: {err}"
    print("KERNEL_OK")
</pallas_src>

<mosaic_0001>
module attributes {stable_mosaic.version = 11 : i64} {
  func.func @kernel(%arg0: i32, %arg1: memref<1x16x256xf32, #tpu.memory_space<vmem>>, %arg2: memref<9x256xf32, #tpu.memory_space<vmem>>, %arg3: memref<16x144xbf16, #tpu.memory_space<vmem>>, %arg4: memref<16x144xbf16, #tpu.memory_space<vmem>>, %arg5: memref<16x2xf32, #tpu.memory_space<vmem>>, %arg6: memref<4x16xf32, #tpu.memory_space<vmem>>, %arg7: memref<16x4xf32, #tpu.memory_space<vmem>>, %arg8: memref<256x1xf32, #tpu.memory_space<vmem>>, %arg9: memref<1x256xf32, #tpu.memory_space<vmem>>, %arg10: memref<1x16x256xf32, #tpu.memory_space<vmem>>) attributes {dimension_semantics = [#tpu.dimension_semantics<parallel>], iteration_bounds = array<i64: 2>, scalar_prefetch = 0 : i64, scratch_operands = 0 : i64, tpu.core_type = #tpu.core_type<tc>, window_params = [{transform_indices = @transform_0, window_bounds = array<i64: 1, 16, 256>}, {pipeline_mode = #tpu.pipeline_mode<synchronous>, transform_indices = @transform_1, window_bounds = array<i64: 9, 256>}, {pipeline_mode = #tpu.pipeline_mode<synchronous>, transform_indices = @transform_2, window_bounds = array<i64: 16, 144>}, {pipeline_mode = #tpu.pipeline_mode<synchronous>, transform_indices = @transform_3, window_bounds = array<i64: 16, 144>}, {pipeline_mode = #tpu.pipeline_mode<synchronous>, transform_indices = @transform_4, window_bounds = array<i64: 16, 2>}, {pipeline_mode = #tpu.pipeline_mode<synchronous>, transform_indices = @transform_5, window_bounds = array<i64: 4, 16>}, {pipeline_mode = #tpu.pipeline_mode<synchronous>, transform_indices = @transform_6, window_bounds = array<i64: 16, 4>}, {pipeline_mode = #tpu.pipeline_mode<synchronous>, transform_indices = @transform_7, window_bounds = array<i64: 256, 1>}, {pipeline_mode = #tpu.pipeline_mode<synchronous>, transform_indices = @transform_8, window_bounds = array<i64: 1, 256>}, {transform_indices = @transform_9, window_bounds = array<i64: 1, 16, 256>}]} {
    %c0 = arith.constant 0 : index
    %c0_0 = arith.constant 0 : index
    %c0_1 = arith.constant 0 : index
    %0 = vector.load %arg1[%c0, %c0_0, %c0_1] : memref<1x16x256xf32, #tpu.memory_space<vmem>>, vector<1x16x256xf32>
    %1 = vector.shape_cast %0 : vector<1x16x256xf32> to vector<16x256xf32>
    %c0_2 = arith.constant 0 : index
    %c0_3 = arith.constant 0 : index
    %2 = vector.load %arg2[%c0_2, %c0_3] : memref<9x256xf32, #tpu.memory_space<vmem>>, vector<9x256xf32>
    %c0_4 = arith.constant 0 : index
    %c0_5 = arith.constant 0 : index
    %3 = vector.load %arg5[%c0_4, %c0_5] : memref<16x2xf32, #tpu.memory_space<vmem>>, vector<16x2xf32>
    %c17_i32 = arith.constant 17 : i32
    %4 = tpu.dynamic_rotate %1 by %c17_i32 dim 1 : vector<16x256xf32>, i32 -> vector<16x256xf32>
    %5 = vector.extract_strided_slice %2 {offsets = [0, 0], sizes = [1, 256], strides = [1, 1]} : vector<9x256xf32> to vector<1x256xf32>
    %6 = vector.broadcast %5 : vector<1x256xf32> to vector<16x256xf32>
    %7 = arith.mulf %4, %6 : vector<16x256xf32>
    %c16_i32 = arith.constant 16 : i32
    %8 = tpu.dynamic_rotate %1 by %c16_i32 dim 1 : vector<16x256xf32>, i32 -> vector<16x256xf32>
    %9 = vector.extract_strided_slice %2 {offsets = [1, 0], sizes = [1, 256], strides = [1, 1]} : vector<9x256xf32> to vector<1x256xf32>
    %10 = vector.broadcast %9 : vector<1x256xf32> to vector<16x256xf32>
    %11 = arith.mulf %8, %10 : vector<16x256xf32>
    %c15_i32 = arith.constant 15 : i32
    %12 = tpu.dynamic_rotate %1 by %c15_i32 dim 1 : vector<16x256xf32>, i32 -> vector<16x256xf32>
    %13 = vector.extract_strided_slice %2 {offsets = [2, 0], sizes = [1, 256], strides = [1, 1]} : vector<9x256xf32> to vector<1x256xf32>
    %14 = vector.broadcast %13 : vector<1x256xf32> to vector<16x256xf32>
    %15 = arith.mulf %12, %14 : vector<16x256xf32>
    %c1_i32 = arith.constant 1 : i32
    %16 = tpu.dynamic_rotate %1 by %c1_i32 dim 1 : vector<16x256xf32>, i32 -> vector<16x256xf32>
    %17 = vector.extract_strided_slice %2 {offsets = [3, 0], sizes = [1, 256], strides = [1, 1]} : vector<9x256xf32> to vector<1x256xf32>
    %18 = vector.broadcast %17 : vector<1x256xf32> to vector<16x256xf32>
    %19 = arith.mulf %16, %18 : vector<16x256xf32>
    %20 = vector.extract_strided_slice %2 {offsets = [4, 0], sizes = [1, 256], strides = [1, 1]} : vector<9x256xf32> to vector<1x256xf32>
    %21 = vector.broadcast %20 : vector<1x256xf32> to vector<16x256xf32>
    %22 = arith.mulf %1, %21 : vector<16x256xf32>
    %c255_i32 = arith.constant 255 : i32
    %23 = tpu.dynamic_rotate %1 by %c255_i32 dim 1 : vector<16x256xf32>, i32 -> vector<16x256xf32>
    %24 = vector.extract_strided_slice %2 {offsets = [5, 0], sizes = [1, 256], strides = [1, 1]} : vector<9x256xf32> to vector<1x256xf32>
    %25 = vector.broadcast %24 : vector<1x256xf32> to vector<16x256xf32>
    %26 = arith.mulf %23, %25 : vector<16x256xf32>
    %c241_i32 = arith.constant 241 : i32
    %27 = tpu.dynamic_rotate %1 by %c241_i32 dim 1 : vector<16x256xf32>, i32 -> vector<16x256xf32>
    %28 = vector.extract_strided_slice %2 {offsets = [6, 0], sizes = [1, 256], strides = [1, 1]} : vector<9x256xf32> to vector<1x256xf32>
    %29 = vector.broadcast %28 : vector<1x256xf32> to vector<16x256xf32>
    %30 = arith.mulf %27, %29 : vector<16x256xf32>
    %c240_i32 = arith.constant 240 : i32
    %31 = tpu.dynamic_rotate %1 by %c240_i32 dim 1 : vector<16x256xf32>, i32 -> vector<16x256xf32>
    %32 = vector.extract_strided_slice %2 {offsets = [7, 0], sizes = [1, 256], strides = [1, 1]} : vector<9x256xf32> to vector<1x256xf32>
    %33 = vector.broadcast %32 : vector<1x256xf32> to vector<16x256xf32>
    %34 = arith.mulf %31, %33 : vector<16x256xf32>
    %c239_i32 = arith.constant 239 : i32
    %35 = tpu.dynamic_rotate %1 by %c239_i32 dim 1 : vector<16x256xf32>, i32 -> vector<16x256xf32>
    %36 = vector.extract_strided_slice %2 {offsets = [8, 0], sizes = [1, 256], strides = [1, 1]} : vector<9x256xf32> to vector<1x256xf32>
    %37 = vector.broadcast %36 : vector<1x256xf32> to vector<16x256xf32>
    %38 = arith.mulf %35, %37 : vector<16x256xf32>
    %39 = tpu.concatenate %7, %11, %15, %19, %22, %26, %30, %34, %38 in 0 : vector<16x256xf32>, vector<16x256xf32>, vector<16x256xf32>, vector<16x256xf32>, vector<16x256xf32>, vector<16x256xf32>, vector<16x256xf32>, vector<16x256xf32>, vector<16x256xf32> -> vector<144x256xf32>
    %40 = arith.truncf %39 : vector<144x256xf32> to vector<144x256xbf16>
    %c0_6 = arith.constant 0 : index
    %c0_7 = arith.constant 0 : index
    %41 = vector.load %arg3[%c0_6, %c0_7] : memref<16x144xbf16, #tpu.memory_space<vmem>>, vector<16x144xbf16>
    %cst = arith.constant dense<0.000000e+00> : vector<16x256xf32>
    %42 = tpu.matmul %41, %40, %cst {dimension_numbers = #tpu.dot_dimension_numbers<[1], [0], [0], [1], [0, 0, 1, 1], [], []>} : vector<16x144xbf16>, vector<144x256xbf16>, vector<16x256xf32> -> vector<16x256xf32>
    %43 = vector.extract_strided_slice %3 {offsets = [0, 0], sizes = [16, 1], strides = [1, 1]} : vector<16x2xf32> to vector<16x1xf32>
    %44 = vector.broadcast %43 : vector<16x1xf32> to vector<16x256xf32>
    %45 = arith.addf %42, %44 : vector<16x256xf32>
    %cst_8 = arith.constant 0.000000e+00 : f32
    %46 = vector.broadcast %cst_8 : f32 to vector<16x256xf32>
    %47 = arith.maximumf %45, %46 : vector<16x256xf32>
    %c17_i32_9 = arith.constant 17 : i32
    %48 = tpu.dynamic_rotate %47 by %c17_i32_9 dim 1 : vector<16x256xf32>, i32 -> vector<16x256xf32>
    %49 = vector.extract_strided_slice %2 {offsets = [0, 0], sizes = [1, 256], strides = [1, 1]} : vector<9x256xf32> to vector<1x256xf32>
    %50 = vector.broadcast %49 : vector<1x256xf32> to vector<16x256xf32>
    %51 = arith.mulf %48, %50 : vector<16x256xf32>
    %c16_i32_10 = arith.constant 16 : i32
    %52 = tpu.dynamic_rotate %47 by %c16_i32_10 dim 1 : vector<16x256xf32>, i32 -> vector<16x256xf32>
    %53 = vector.extract_strided_slice %2 {offsets = [1, 0], sizes = [1, 256], strides = [1, 1]} : vector<9x256xf32> to vector<1x256xf32>
    %54 = vector.broadcast %53 : vector<1x256xf32> to vector<16x256xf32>
    %55 = arith.mulf %52, %54 : vector<16x256xf32>
    %c15_i32_11 = arith.constant 15 : i32
    %56 = tpu.dynamic_rotate %47 by %c15_i32_11 dim 1 : vector<16x256xf32>, i32 -> vector<16x256xf32>
    %57 = vector.extract_strided_slice %2 {offsets = [2, 0], sizes = [1, 256], strides = [1, 1]} : vector<9x256xf32> to vector<1x256xf32>
    %58 = vector.broadcast %57 : vector<1x256xf32> to vector<16x256xf32>
    %59 = arith.mulf %56, %58 : vector<16x256xf32>
    %c1_i32_12 = arith.constant 1 : i32
    %60 = tpu.dynamic_rotate %47 by %c1_i32_12 dim 1 : vector<16x256xf32>, i32 -> vector<16x256xf32>
    %61 = vector.extract_strided_slice %2 {offsets = [3, 0], sizes = [1, 256], strides = [1, 1]} : vector<9x256xf32> to vector<1x256xf32>
    %62 = vector.broadcast %61 : vector<1x256xf32> to vector<16x256xf32>
    %63 = arith.mulf %60, %62 : vector<16x256xf32>
    %64 = vector.extract_strided_slice %2 {offsets = [4, 0], sizes = [1, 256], strides = [1, 1]} : vector<9x256xf32> to vector<1x256xf32>
    %65 = vector.broadcast %64 : vector<1x256xf32> to vector<16x256xf32>
    %66 = arith.mulf %47, %65 : vector<16x256xf32>
    %c255_i32_13 = arith.constant 255 : i32
    %67 = tpu.dynamic_rotate %47 by %c255_i32_13 dim 1 : vector<16x256xf32>, i32 -> vector<16x256xf32>
    %68 = vector.extract_strided_slice %2 {offsets = [5, 0], sizes = [1, 256], strides = [1, 1]} : vector<9x256xf32> to vector<1x256xf32>
    %69 = vector.broadcast %68 : vector<1x256xf32> to vector<16x256xf32>
    %70 = arith.mulf %67, %69 : vector<16x256xf32>
    %c241_i32_14 = arith.constant 241 : i32
    %71 = tpu.dynamic_rotate %47 by %c241_i32_14 dim 1 : vector<16x256xf32>, i32 -> vector<16x256xf32>
    %72 = vector.extract_strided_slice %2 {offsets = [6, 0], sizes = [1, 256], strides = [1, 1]} : vector<9x256xf32> to vector<1x256xf32>
    %73 = vector.broadcast %72 : vector<1x256xf32> to vector<16x256xf32>
    %74 = arith.mulf %71, %73 : vector<16x256xf32>
    %c240_i32_15 = arith.constant 240 : i32
    %75 = tpu.dynamic_rotate %47 by %c240_i32_15 dim 1 : vector<16x256xf32>, i32 -> vector<16x256xf32>
    %76 = vector.extract_strided_slice %2 {offsets = [7, 0], sizes = [1, 256], strides = [1, 1]} : vector<9x256xf32> to vector<1x256xf32>
    %77 = vector.broadcast %76 : vector<1x256xf32> to vector<16x256xf32>
    %78 = arith.mulf %75, %77 : vector<16x256xf32>
    %c239_i32_16 = arith.constant 239 : i32
    %79 = tpu.dynamic_rotate %47 by %c239_i32_16 dim 1 : vector<16x256xf32>, i32 -> vector<16x256xf32>
    %80 = vector.extract_strided_slice %2 {offsets = [8, 0], sizes = [1, 256], strides = [1, 1]} : vector<9x256xf32> to vector<1x256xf32>
    %81 = vector.broadcast %80 : vector<1x256xf32> to vector<16x256xf32>
    %82 = arith.mulf %79, %81 : vector<16x256xf32>
    %83 = tpu.concatenate %51, %55, %59, %63, %66, %70, %74, %78, %82 in 0 : vector<16x256xf32>, vector<16x256xf32>, vector<16x256xf32>, vector<16x256xf32>, vector<16x256xf32>, vector<16x256xf32>, vector<16x256xf32>, vector<16x256xf32>, vector<16x256xf32> -> vector<144x256xf32>
    %84 = arith.truncf %83 : vector<144x256xf32> to vector<144x256xbf16>
    %c0_17 = arith.constant 0 : index
    %c0_18 = arith.constant 0 : index
    %85 = vector.load %arg4[%c0_17, %c0_18] : memref<16x144xbf16, #tpu.memory_space<vmem>>, vector<16x144xbf16>
    %cst_19 = arith.constant dense<0.000000e+00> : vector<16x256xf32>
    %86 = tpu.matmul %85, %84, %cst_19 {dimension_numbers = #tpu.dot_dimension_numbers<[1], [0], [0], [1], [0, 0, 1, 1], [], []>} : vector<16x144xbf16>, vector<144x256xbf16>, vector<16x256xf32> -> vector<16x256xf32>
    %87 = vector.extract_strided_slice %3 {offsets = [0, 1], sizes = [16, 1], strides = [1, 1]} : vector<16x2xf32> to vector<16x1xf32>
    %88 = vector.broadcast %87 : vector<16x1xf32> to vector<16x256xf32>
    %89 = arith.addf %86, %88 : vector<16x256xf32>
    %cst_20 = arith.constant dense<0.000000e+00> : vector<16xf32>
    %90 = vector.multi_reduction <add>, %89, %cst_20 [1] : vector<16x256xf32> to vector<16xf32>
    %91 = vector.shape_cast %90 : vector<16xf32> to vector<16x1xf32>
    %cst_21 = arith.constant 2.560000e+02 : f32
    %92 = vector.broadcast %cst_21 : f32 to vector<16x1xf32>
    %93 = arith.divf %91, %92 : vector<16x1xf32>
    %c0_22 = arith.constant 0 : index
    %c0_23 = arith.constant 0 : index
    %94 = vector.load %arg6[%c0_22, %c0_23] : memref<4x16xf32, #tpu.memory_space<vmem>>, vector<4x16xf32>
    %cst_24 = arith.constant dense<0.000000e+00> : vector<4x1xf32>
    %95 = tpu.matmul %94, %93, %cst_24 {dimension_numbers = #tpu.dot_dimension_numbers<[1], [0], [0], [1], [0, 0, 1, 1], [], []>} : vector<4x16xf32>, vector<16x1xf32>, vector<4x1xf32> -> vector<4x1xf32>
    %cst_25 = arith.constant 0.000000e+00 : f32
    %96 = vector.broadcast %cst_25 : f32 to vector<4x1xf32>
    %97 = arith.maximumf %95, %96 : vector<4x1xf32>
    %c0_26 = arith.constant 0 : index
    %c0_27 = arith.constant 0 : index
    %98 = vector.load %arg7[%c0_26, %c0_27] : memref<16x4xf32, #tpu.memory_space<vmem>>, vector<16x4xf32>
    %cst_28 = arith.constant dense<0.000000e+00> : vector<16x1xf32>
    %99 = tpu.matmul %98, %97, %cst_28 {dimension_numbers = #tpu.dot_dimension_numbers<[1], [0], [0], [1], [0, 0, 1, 1], [], []>} : vector<16x4xf32>, vector<4x1xf32>, vector<16x1xf32> -> vector<16x1xf32>
    %cst_29 = arith.constant 5.000000e-01 : f32
    %100 = vector.broadcast %cst_29 : f32 to vector<16x1xf32>
    %101 = arith.mulf %100, %99 : vector<16x1xf32>
    %102 = math.tanh %101 : vector<16x1xf32>
    %cst_30 = arith.constant 1.000000e+00 : f32
    %103 = vector.broadcast %cst_30 : f32 to vector<16x1xf32>
    %104 = arith.addf %102, %103 : vector<16x1xf32>
    %cst_31 = arith.constant 5.000000e-01 : f32
    %105 = vector.broadcast %cst_31 : f32 to vector<16x1xf32>
    %106 = arith.mulf %105, %104 : vector<16x1xf32>
    %107 = vector.broadcast %106 : vector<16x1xf32> to vector<16x256xf32>
    %108 = arith.mulf %89, %107 : vector<16x256xf32>
    %109 = arith.addf %108, %1 : vector<16x256xf32>
    %cst_32 = arith.constant 0.000000e+00 : f32
    %110 = vector.broadcast %cst_32 : f32 to vector<16x256xf32>
    %111 = arith.maximumf %109, %110 : vector<16x256xf32>
    %c0_33 = arith.constant 0 : index
    %c0_34 = arith.constant 0 : index
    %c0_35 = arith.constant 0 : index
    %112 = vector.load %arg10[%c0_33, %c0_34, %c0_35] : memref<1x16x256xf32, #tpu.memory_space<vmem>>, vector<1x16x256xf32>
    %113 = vector.shape_cast %112 : vector<1x16x256xf32> to vector<16x256xf32>
    %114 = vector.shape_cast %111 : vector<16x256xf32> to vector<1x16x256xf32>
    tpu.vector_store %arg10[%c0_33, %c0_34, %c0_35], %114 {strides = array<i32>} : memref<1x16x256xf32, #tpu.memory_space<vmem>>, vector<1x16x256xf32>,
    return
  }
  func.func @transform_0(%arg0: i32) -> (i32, i32, i32) {
    %c0_i32 = arith.constant 0 : i32
    %c0_i32_0 = arith.constant 0 : i32
    %c0_i32_1 = arith.constant 0 : i32
    return %arg0, %c0_i32, %c0_i32_0 : i32, i32, i32
  }
  func.func @transform_1(%arg0: i32) -> (i32, i32) {
    %c0_i32 = arith.constant 0 : i32
    %c0_i32_0 = arith.constant 0 : i32
    %c0_i32_1 = arith.constant 0 : i32
    return %c0_i32, %c0_i32_0 : i32, i32
  }
  func.func @transform_2(%arg0: i32) -> (i32, i32) {
    %c0_i32 = arith.constant 0 : i32
    %c0_i32_0 = arith.constant 0 : i32
    %c0_i32_1 = arith.constant 0 : i32
    return %c0_i32, %c0_i32_0 : i32, i32
  }
  func.func @transform_3(%arg0: i32) -> (i32, i32) {
    %c0_i32 = arith.constant 0 : i32
    %c0_i32_0 = arith.constant 0 : i32
    %c0_i32_1 = arith.constant 0 : i32
    return %c0_i32, %c0_i32_0 : i32, i32
  }
  func.func @transform_4(%arg0: i32) -> (i32, i32) {
    %c0_i32 = arith.constant 0 : i32
    %c0_i32_0 = arith.constant 0 : i32
    %c0_i32_1 = arith.constant 0 : i32
    return %c0_i32, %c0_i32_0 : i32, i32
  }
  func.func @transform_5(%arg0: i32) -> (i32, i32) {
    %c0_i32 = arith.constant 0 : i32
    %c0_i32_0 = arith.constant 0 : i32
    %c0_i32_1 = arith.constant 0 : i32
    return %c0_i32, %c0_i32_0 : i32, i32
  }
  func.func @transform_6(%arg0: i32) -> (i32, i32) {
    %c0_i32 = arith.constant 0 : i32
    %c0_i32_0 = arith.constant 0 : i32
    %c0_i32_1 = arith.constant 0 : i32
    return %c0_i32, %c0_i32_0 : i32, i32
  }
  func.func @transform_7(%arg0: i32) -> (i32, i32) {
    %c0_i32 = arith.constant 0 : i32
    %c0_i32_0 = arith.constant 0 : i32
    %c0_i32_1 = arith.constant 0 : i32
    return %c0_i32, %c0_i32_0 : i32, i32
  }
  func.func @transform_8(%arg0: i32) -> (i32, i32) {
    %c0_i32 = arith.constant 0 : i32
    %c0_i32_0 = arith.constant 0 : i32
    %c0_i32_1 = arith.constant 0 : i32
    return %c0_i32, %c0_i32_0 : i32, i32
  }
  func.func @transform_9(%arg0: i32) -> (i32, i32, i32) {
    %c0_i32 = arith.constant 0 : i32
    %c0_i32_0 = arith.constant 0 : i32
    %c0_i32_1 = arith.constant 0 : i32
    return %arg0, %c0_i32, %c0_i32_0 : i32, i32, i32
  }
}

</mosaic_0001>

<bundles_post_ra>
// kernel: basic_block_dwa_forward.1
= control target key start
LH: loop header
LB: loop body
LE: loop exit
PB: predicated region body
PF: predicated region fallthrough
CT: control target
= control target key end

     0   :  { %s1278_s30 = smov 0   ;;  %s1786_s0 = inlined_call_operand.vmem [shape: f32[2,16,256], index: 0, kind: input, shape index: {}]   ;;  %s1787_s1 = inlined_call_operand.vmem [shape: f32[9,256], index: 1, kind: input, shape index: {}]   ;;  %s1788_s2 = inlined_call_operand.vmem [shape: bf16[16,144], index: 2, kind: input, shape index: {}]   ;;  %s1789_s3 = inlined_call_operand.vmem [shape: bf16[16,144], index: 3, kind: input, shape index: {}]   ;;  %s1790_s4 = inlined_call_operand.vmem [shape: f32[16,2], index: 4, kind: input, shape index: {}]   ;;  %s1791_s5 = inlined_call_operand.vmem [shape: f32[4,16], index: 5, kind: input, shape index: {}]   ;;  %s1792_s6 = inlined_call_operand.vmem [shape: f32[16,4], index: 6, kind: input, shape index: {}]   ;;  %s1793_s7 = inlined_call_operand.vmem [shape: f32[256,1], index: 7, kind: input, shape index: {}]   ;;  %s1794_s8 = inlined_call_operand.vmem [shape: f32[1,256], index: 8, kind: input, shape index: {}]   ;;  %s1795_s9 = inlined_call_operand.vmem [shape: f32[2,16,256], index: 9, kind: output, shape index: {}]  }
   0x1 LB: > { %s1124_s10 = sadd.s32 4294967295, %s1213_s30   ;;  %p1128_p0 = scmp.ge.s32.totalorder %s1213_s30, 1  ;;  %s1213_s30 = sphi %s1278_s30, %s19_s30  }
   0x2   : > { %p287_p1 = scmp.lt.s32.totalorder %s1213_s30, 3 }
   0x4   : > { %p288_p2 = pnand %p1128_p0, %p287_p1 }
   0x5   : > { %p323_p3 = scmp.lt.s32.totalorder (!%p288_p2), %s1124_s10, 1  ;;  %s1215_s13 = smov (!%p288_p2), 17   ;;  %v1199_v4 = vld [vmem:[%s1788_s2 + $0x4] ss:$8 sps:$4 sm:$0xff] (!%p288_p2)   ;;  %vm597_vm0 = vcmask (!%p288_p2), 130048   ;;  %v1223_v5 = vmov (!%p288_p2), 0   ;;  %v352_v8 = vlaneseq (!%p288_p2) }
   0x6   : > { %291 = sbr.rel (%p288_p2) target bundleno = 1552 (0x610), region = 56  ;;  %s1216_s14 = smov (!%p288_p2), 16   ;;  %1137 = vmatprep.mubr.msk.bf16.mxu0 (!%p288_p2), %vm597_vm0, %v1199_v4  ;;  %1191 = vset.pattern.permute.xlu0 (!%p288_p2), %v1223_v5  ;;  %v1375_v6 = vld [vmem:[%s1790_s4] sm:$0xff] (!%p288_p2)  ;;  %v1380_v7 = vld [vmem:[%s1790_s4 + $0x8] sm:$0xff] (!%p288_p2)  ;;  %vm1226_vm9 = vmmov (!%p288_p2), 0   ;;  %vm949_vm10 = vcmask (!%p288_p2), 31744  }
   0x7   : > { %s1217_s15 = smov (!%p288_p2), 15   ;;  %s1218_s16 = smov (!%p288_p2), 1   ;;  %1192 = vset.pattern.permute.xlu1 (!%p288_p2), %v1223_v5  ;;  %v1384_v9 = vshrl.u32 (!%p288_p2), %v352_v8, 7  ;;  %v1386_v10 = vand.u32 (!%p288_p2), 127, %v352_v8  ;;  %v1392_v12 = vld [vmem:[%s1787_s1] sm:$0xff] (!%p288_p2)  ;;  %v1397_v13 = vld [vmem:[%s1787_s1 + $0x8] sm:$0xff] (!%p288_p2) }
   0x8   : > { %s1219_s17 = smov (!%p288_p2), 127   ;;  %s1220_s18 = smov (!%p288_p2), 113   ;;  %vm956_vm11 = vcmask (!%p288_p2), 1043456  }
   0x9   : > { %s1221_s19 = smov (!%p288_p2), 112   ;;  %s1222_s22 = smov (!%p288_p2), 111   ;;  %v361_v11 = vsub.s32 (!%p288_p2), 0, %v1384_v9  ;;  %vm354_vm1 = vcmp.lt.s32.totalorder (!%p288_p2), %v1386_v10, 17  ;;  %v386_v24 = vsub.s32 (!%p288_p2), 1, %v1384_v9  ;;  %vm379_vm2 = vcmp.lt.s32.totalorder (!%p288_p2), %v1386_v10, 16 }
   0xa   : > { %v411_v37 = vsub.s32 (!%p288_p2), 2, %v1384_v9  ;;  %vm404_vm3 = vcmp.lt.s32.totalorder (!%p288_p2), %v1386_v10, 15  ;;  %v436_v54 = vsub.s32 (!%p288_p2), 3, %v1384_v9  ;;  %v448_v55 = vsub.s32 (!%p288_p2), 4, %v1384_v9 }
   0xb   : > { %v1401_v16 = vrot.slane (!%p288_p2), %v1392_v12, %v361_v11  ;;  %v1404_v17 = vrot.slane (!%p288_p2), %v1397_v13, %v361_v11  ;;  %v1421_v33 = vrot.slane (!%p288_p2), %v1392_v12, %v386_v24  ;;  %v1424_v34 = vrot.slane (!%p288_p2), %v1397_v13, %v386_v24 }
   0xc   : > { %v1441_v50 = vrot.slane (!%p288_p2), %v1392_v12, %v411_v37  ;;  %v1444_v51 = vrot.slane (!%p288_p2), %v1397_v13, %v411_v37  ;;  %vm429_vm4 = vcmp.lt.s32.totalorder (!%p288_p2), %v1386_v10, 1  ;;  %vm466_vm5 = vcmp.lt.s32.totalorder (!%p288_p2), %v1386_v10, 127 }
   0xd   : > { %s1797_s10 = smov (!%p323_p3, %s1124_s10), 1  ;;  %vm491_vm6 = vcmp.lt.s32.totalorder %v1386_v10, 113  ;;  %vm516_vm7 = vcmp.lt.s32.totalorder %v1386_v10, 112  ;;  %vm541_vm8 = vcmp.lt.s32.totalorder %v1386_v10, 111 }
   0xe   : > { %s1147_s7 = sshll.u32 %s1797_s10, 5 }
   0xf   : > { %s327_s12 = scalar_lea.vmem %s1786_s0, %s1147_s7  ;;  %s332_s29 = scalar_lea.vmem %s1795_s9, %s1147_s7 }
  0x10   : > { %v1294_v0 = vld [vmem:[%s327_s12 + $0x8] sm:$0xff]  ;;  %v1296_v1 = vld [vmem:[%s327_s12] sm:$0xff]  ;;  %v1302_v2 = vld [vmem:[%s327_s12 + $0x18] sm:$0xff] }
  0x11   : > { %348 = vrot.lane.b32.xlu1 %v1294_v0, %s1215_s13  ;;  %344 = vrot.lane.b32.xlu0 %v1296_v1, %s1215_s13  ;;  %v1304_v3 = vld [vmem:[%s327_s12 + $0x10] sm:$0xff] }
  0x15   : > { %350 = vrot.lane.b32.xlu1 %v1302_v2, %s1215_s13  ;;  %346 = vrot.lane.b32.xlu0 %v1304_v3, %s1215_s13 }
  0x19   : > { %373 = vrot.lane.b32.xlu1 %v1304_v3, %s1216_s14  ;;  %371 = vrot.lane.b32.xlu0 %v1296_v1, %s1216_s14 }
  0x1d   : > { %377 = vrot.lane.b32.xlu1 %v1302_v2, %s1216_s14  ;;  %375 = vrot.lane.b32.xlu0 %v1294_v0, %s1216_s14 }
  0x21   : > { %398 = vrot.lane.b32.xlu1 %v1304_v3, %s1217_s15  ;;  %396 = vrot.lane.b32.xlu0 %v1296_v1, %s1217_s15 }
  0x25   : > { %402 = vrot.lane.b32.xlu1 %v1302_v2, %s1217_s15  ;;  %400 = vrot.lane.b32.xlu0 %v1294_v0, %s1217_s15 }
  0x29   : > { %423 = vrot.lane.b32.xlu1 %v1304_v3, %s1218_s16  ;;  %421 = vrot.lane.b32.xlu0 %v1296_v1, %s1218_s16 }
  0x2d   : > { %427 = vrot.lane.b32.xlu1 %v1302_v2, %s1218_s16  ;;  %425 = vrot.lane.b32.xlu0 %v1294_v0, %s1218_s16 }
  0x31   : > { %460 = vrot.lane.b32.xlu1 %v1304_v3, %s1219_s17  ;;  %458 = vrot.lane.b32.xlu0 %v1296_v1, %s1219_s17 }
  0x35   : > { %464 = vrot.lane.b32.xlu1 %v1302_v2, %s1219_s17  ;;  %462 = vrot.lane.b32.xlu0 %v1294_v0, %s1219_s17 }
  0x39   : > { %485 = vrot.lane.b32.xlu1 %v1304_v3, %s1220_s18  ;;  %483 = vrot.lane.b32.xlu0 %v1296_v1, %s1220_s18 }
  0x3d   : > { %489 = vrot.lane.b32.xlu1 %v1302_v2, %s1220_s18  ;;  %487 = vrot.lane.b32.xlu0 %v1294_v0, %s1220_s18 }
  0x41   : > { %510 = vrot.lane.b32.xlu1 %v1304_v3, %s1221_s19  ;;  %508 = vrot.lane.b32.xlu0 %v1296_v1, %s1221_s19 }
  0x45   : > { %514 = vrot.lane.b32.xlu1 %v1302_v2, %s1221_s19  ;;  %512 = vrot.lane.b32.xlu0 %v1294_v0, %s1221_s19 }
  0x49   : > { %535 = vrot.lane.b32.xlu1 %v1304_v3, %s1222_s22  ;;  %533 = vrot.lane.b32.xlu0 %v1296_v1, %s1222_s22 }
  0x4d   : > { %539 = vrot.lane.b32.xlu1 %v1302_v2, %s1222_s22  ;;  %537 = vrot.lane.b32.xlu0 %v1294_v0, %s1222_s22 }
  0x51   : > { %580 = vperm.xlu0 %1191, %v1375_v6   ;;  %585 = vperm.xlu1 %1192, %v1380_v7  }
  0x83   : > { %v349_v14 = vpop.permute.xlu1 %348  ;;  %v345_v15 = vpop.permute.xlu0 %344 }
  0x84   : > { %v355_v18 = vsel %vm354_vm1, %v345_v15, %v349_v14  ;;  %v357_v19 = vsel %vm354_vm1, %v349_v14, %v345_v15  ;;  %v1461_v15 = vrot.slane %v1397_v13, %v448_v55 }
  0x85   : > { %v367_v25 = vmul.f32 %v1401_v16, %v357_v19  ;;  %v368_v27 = vmul.f32 %v1404_v17, %v355_v18  ;;  %v1465_v18 = vrot.slane %v1392_v12, %v436_v54  ;;  %v1468_v19 = vrot.slane %v1397_v13, %v436_v54 }
  0x86   : > { %v455_v24 = vmul.f32 %v1461_v15, %v1294_v0 }
  0x87   : > { %v351_v20 = vpop.permute.xlu1 %350  ;;  %v347_v21 = vpop.permute.xlu0 %346 }
  0x88   : > { %v356_v22 = vsel %vm354_vm1, %v347_v21, %v351_v20  ;;  %v358_v23 = vsel %vm354_vm1, %v351_v20, %v347_v21  ;;  %v1471_v20 = vrot.slane %v1392_v12, %v448_v55 }
  0x89   : > { %v369_v26 = vmul.f32 %v1401_v16, %v358_v23  ;;  %v370_v28 = vmul.f32 %v1404_v17, %v356_v22  ;;  %v473_v23 = vsub.s32 5, %v1384_v9 }
  0x8a   : > { %v456_v37 = vmul.f32 %v1471_v20, %v1304_v3 }
  0x8b   : > { %v374_v29 = vpop.permute.xlu1 %373  ;;  %v372_v30 = vpop.permute.xlu0 %371  ;;  %v559_v31 = vpack.c.bf16 %v370_v28, %v368_v27  ;;  %v558_v32 = vpack.c.bf16 %v369_v26, %v367_v25  ;;  %v457_v25 = vmul.f32 %v1461_v15, %v1302_v2 }
  0x8d   : > { %601 = vmatprep.subr.bf16.mxu0 %v559_v31 }
  0x8e   : > { %602 = vmatpush1.bf16.msra.mxu0 %v558_v32 }
  0x8f   : > { %v378_v35 = vpop.permute.xlu1 %377  ;;  %v376_v36 = vpop.permute.xlu0 %375 }
  0x90   : > { %v381_v38 = vsel %vm379_vm2, %v374_v29, %v378_v35  ;;  %v383_v39 = vsel %vm379_vm2, %v378_v35, %v374_v29  ;;  %v380_v40 = vsel %vm379_vm2, %v372_v30, %v376_v36  ;;  %v382_v41 = vsel %vm379_vm2, %v376_v36, %v372_v30 }
  0x91   : > { %v394_v42 = vmul.f32 %v1421_v33, %v383_v39  ;;  %v395_v43 = vmul.f32 %v1424_v34, %v381_v38  ;;  %v392_v44 = vmul.f32 %v1421_v33, %v382_v41  ;;  %v393_v45 = vmul.f32 %v1424_v34, %v380_v40 }
  0x92   : > { %v454_v36 = vmul.f32 %v1471_v20, %v1296_v1 }
  0x93   : > { %v399_v46 = vpop.permute.xlu1 %398  ;;  %v397_v47 = vpop.permute.xlu0 %396  ;;  %v561_v48 = vpack.c.bf16 %v395_v43, %v393_v45  ;;  %v560_v49 = vpack.c.bf16 %v394_v42, %v392_v44  ;;  %v567_v42 = vpack.c.bf16 %v457_v25, %v455_v24  ;;  %v1496_v43 = vrot.slane %v1392_v12, %v473_v23 }
  0x94   : > { %v1499_v44 = vrot.slane %v1397_v13, %v473_v23  ;;  %v566_v45 = vpack.c.bf16 %v456_v37, %v454_v36 }
  0x95   : > { %603 = vmatprep.subr.bf16.mxu0 %v561_v48  ;;  %v498_v48 = vsub.s32 6, %v1384_v9 }
  0x96   : > { %604 = vmatpush1.bf16.msra.mxu0 %v560_v49 }
  0x97   : > { %v403_v52 = vpop.permute.xlu1 %402  ;;  %v401_v53 = vpop.permute.xlu0 %400 }
  0x98   : > { %v406_v56 = vsel %vm404_vm3, %v399_v46, %v403_v52  ;;  %v408_v57 = vsel %vm404_vm3, %v403_v52, %v399_v46  ;;  %v405_v58 = vsel %vm404_vm3, %v397_v47, %v401_v53  ;;  %v407_v59 = vsel %vm404_vm3, %v401_v53, %v397_v47 }
  0x99   : > { %v419_v60 = vmul.f32 %v1441_v50, %v408_v57  ;;  %v420_v61 = vmul.f32 %v1444_v51, %v406_v56  ;;  %v417_v62 = vmul.f32 %v1441_v50, %v407_v59  ;;  %v418_v63 = vmul.f32 %v1444_v51, %v405_v58 }
  0x9b   : > { %v424_v4 = vpop.permute.xlu1 %423  ;;  %v422_v8 = vpop.permute.xlu0 %421  ;;  %v563_v11 = vpack.c.bf16 %v420_v61, %v418_v63  ;;  %v562_v14 = vpack.c.bf16 %v419_v60, %v417_v62  ;;  %v1516_v63 = vrot.slane %v1392_v12, %v498_v48 }
  0x9d   : > { %605 = vmatprep.subr.bf16.mxu0 %v563_v11 }
  0x9e   : > { %606 = vmatpush1.bf16.msra.mxu0 %v562_v14  ;;  %v523_v14 = vsub.s32 7, %v1384_v9 }
  0x9f   : > { %v428_v21 = vpop.permute.xlu1 %427  ;;  %v426_v22 = vpop.permute.xlu0 %425 }
  0xa0   : > { %v431_v26 = vsel %vm429_vm4, %v424_v4, %v428_v21  ;;  %v433_v27 = vsel %vm429_vm4, %v428_v21, %v424_v4  ;;  %v430_v28 = vsel %vm429_vm4, %v422_v8, %v426_v22  ;;  %v432_v29 = vsel %vm429_vm4, %v426_v22, %v422_v8 }
  0xa1   : > { %v444_v30 = vmul.f32 %v1465_v18, %v433_v27  ;;  %v445_v31 = vmul.f32 %v1468_v19, %v431_v26  ;;  %v442_v32 = vmul.f32 %v1465_v18, %v432_v29  ;;  %v443_v35 = vmul.f32 %v1468_v19, %v430_v28 }
  0xa2   : > { %v1519_v4 = vrot.slane %v1397_v13, %v498_v48 }
  0xa3   : > { %v461_v38 = vpop.permute.xlu1 %460  ;;  %v459_v39 = vpop.permute.xlu0 %458  ;;  %v565_v40 = vpack.c.bf16 %v445_v31, %v443_v35  ;;  %v564_v41 = vpack.c.bf16 %v444_v30, %v442_v32  ;;  %v1536_v32 = vrot.slane %v1392_v12, %v523_v14  ;;  %v1539_v35 = vrot.slane %v1397_v13, %v523_v14 }
  0xa5   : > { %607 = vmatprep.subr.bf16.mxu0 %v565_v40 }
  0xa6   : > { %608 = vmatpush1.bf16.msra.mxu0 %v564_v41 }
  0xa7   : > { %v465_v46 = vpop.permute.xlu1 %464  ;;  %v463_v47 = vpop.permute.xlu0 %462  ;;  %609 = vmatprep.subr.bf16.mxu0 %v567_v42 }
  0xa8   : > { %v468_v49 = vsel %vm466_vm5, %v461_v38, %v465_v46  ;;  %v470_v52 = vsel %vm466_vm5, %v465_v46, %v461_v38  ;;  %v467_v53 = vsel %vm466_vm5, %v459_v39, %v463_v47  ;;  %v469_v54 = vsel %vm466_vm5, %v463_v47, %v459_v39 }
  0xa9   : > { %v481_v55 = vmul.f32 %v1496_v43, %v468_v49  ;;  %v482_v56 = vmul.f32 %v1499_v44, %v470_v52  ;;  %v479_v57 = vmul.f32 %v1496_v43, %v467_v53  ;;  %v480_v58 = vmul.f32 %v1499_v44, %v469_v54  ;;  %v1557_v52 = vld [vmem:[%s1787_s1 + $0x10] ss:$0 sm:$0xff]  ;;  %v1562_v53 = vld [vmem:[%s1787_s1 + $0x18] ss:$0 sm:$0xff] }
  0xaa   : > { %610 = vmatpush1.bf16.msra.mxu0 %v566_v45 }
  0xab   : > { %v486_v59 = vpop.permute.xlu1 %485  ;;  %v484_v60 = vpop.permute.xlu0 %483  ;;  %v569_v61 = vpack.c.bf16 %v482_v56, %v480_v58  ;;  %v568_v62 = vpack.c.bf16 %v481_v55, %v479_v57 }
  0xad   : > { %611 = vmatprep.subr.bf16.mxu0 %v569_v61 }
  0xae   : > { %612 = vmatpush1.bf16.msra.mxu0 %v568_v62 }
  0xaf   : > { %v490_v8 = vpop.permute.xlu1 %489  ;;  %v488_v11 = vpop.permute.xlu0 %487 }
  0xb0   : > { %v493_v21 = vsel %vm491_vm6, %v486_v59, %v490_v8  ;;  %v495_v22 = vsel %vm491_vm6, %v490_v8, %v486_v59  ;;  %v492_v23 = vsel %vm491_vm6, %v484_v60, %v488_v11  ;;  %v494_v24 = vsel %vm491_vm6, %v488_v11, %v484_v60 }
  0xb1   : > { %v506_v25 = vmul.f32 %v1516_v63, %v493_v21  ;;  %v507_v26 = vmul.f32 %v1519_v4, %v495_v22  ;;  %v504_v27 = vmul.f32 %v1516_v63, %v492_v23  ;;  %v505_v9 = vmul.f32 %v1519_v4, %v494_v24  ;;  %v1197_v21 = vld [vmem:[%s1788_s2] ss:$8 sps:$4 sm:$0xff]  }
  0xb3   : > { %v511_v28 = vpop.permute.xlu1 %510  ;;  %v509_v29 = vpop.permute.xlu0 %508  ;;  %v571_v30 = vpack.c.bf16 %v507_v26, %v505_v9  ;;  %v570_v31 = vpack.c.bf16 %v506_v25, %v504_v27 }
  0xb5   : > { %613 = vmatprep.subr.bf16.mxu0 %v571_v30 }
  0xb6   : > { %614 = vmatpush1.bf16.msra.mxu0 %v570_v31 }
  0xb7   : > { %v515_v36 = vpop.permute.xlu1 %514  ;;  %v513_v37 = vpop.permute.xlu0 %512 }
  0xb8   : > { %v518_v38 = vsel %vm516_vm7, %v511_v28, %v515_v36  ;;  %v520_v39 = vsel %vm516_vm7, %v515_v36, %v511_v28  ;;  %v517_v40 = vsel %vm516_vm7, %v509_v29, %v513_v37  ;;  %v519_v41 = vsel %vm516_vm7, %v513_v37, %v509_v29 }
  0xb9   : > { %v531_v12 = vmul.f32 %v1536_v32, %v518_v38  ;;  %v532_v13 = vmul.f32 %v1539_v35, %v520_v39  ;;  %v529_v42 = vmul.f32 %v1536_v32, %v517_v40  ;;  %v530_v45 = vmul.f32 %v1539_v35, %v519_v41 }
  0xbb   : > { %v536_v46 = vpop.permute.xlu1 %535  ;;  %v534_v47 = vpop.permute.xlu0 %533  ;;  %v573_v48 = vpack.c.bf16 %v532_v13, %v530_v45  ;;  %v572_v49 = vpack.c.bf16 %v531_v12, %v529_v42 }
  0xbd   : > { %615 = vmatprep.subr.bf16.mxu0 %v573_v48 }
  0xbe   : > { %616 = vmatpush1.bf16.msra.mxu0 %v572_v49 }
  0xbf   : > { %v540_v54 = vpop.permute.xlu1 %539  ;;  %v538_v55 = vpop.permute.xlu0 %537 }
  0xc0   : > { %v543_v56 = vsel %vm541_vm8, %v536_v46, %v540_v54  ;;  %v545_v57 = vsel %vm541_vm8, %v540_v54, %v536_v46  ;;  %v542_v58 = vsel %vm541_vm8, %v534_v47, %v538_v55  ;;  %v544_v59 = vsel %vm541_vm8, %v538_v55, %v534_v47 }
  0xc1   : > { %v556_v60 = vmul.f32 %v1557_v52, %v543_v56  ;;  %v557_v61 = vmul.f32 %v1562_v53, %v545_v57  ;;  %v554_v62 = vmul.f32 %v1557_v52, %v542_v58  ;;  %v555_v8 = vmul.f32 %v1562_v53, %v544_v59 }
  0xc3   : > { %v575_v11 = vpack.c.bf16 %v557_v61, %v555_v8  ;;  %v574_v14 = vpack.c.bf16 %v556_v60, %v554_v62 }
  0xc5   : > { %617 = vmatprep.subr.bf16.mxu0 %v575_v11 }
  0xc6   : > { %618 = vmatpush1.bf16.msra.mxu0 %v574_v14 }
  0xc9   : > { %634 = vmatmul.mubr.bf16.vlgmr.msra.gmra.mrb[0].mxu0 %v1197_v21 }
  0xd0   : > { %v581_v22 = vpop.permute.xlu0 %580  ;;  %v586_v24 = vpop.permute.xlu1 %585 }
 0x19c   : > { %v635_v23 = vpop.f32.mrb[0].mxu0 }
 0x19d   : > { %v636_v25 = vadd.f32 %v635_v23, %v581_v22  ;;  %v637_v26 = vpop.f32.mrb[1].mxu0 }
 0x19e   : > { %v638_v27 = vadd.f32 %v637_v26, %v581_v22  ;;  %v639_v9 = vpop.f32.mrb[2].mxu0 }
 0x19f   : > { %v644_v28 = vmax.f32 %v636_v25, 0.0  ;;  %v640_v29 = vadd.f32 %v639_v9, %v586_v24  ;;  %v641_v30 = vpop.f32.mrb[3].mxu0 }
 0x1a0   : > { %v645_v31 = vmax.f32 %v638_v27, 0.0  ;;  %v642_v36 = vadd.f32 %v641_v30, %v586_v24 }
 0x1a1   : > { %v646_v37 = vmax.f32 %v640_v29, 0.0  ;;  %648 = vrot.lane.b32.xlu1 %v644_v28, %s1215_s13  ;;  %v1582_v39 = vmul.f32 %v644_v28, %v1471_v20 }
 0x1a2   : > { %v647_v38 = vmax.f32 %v642_v36, 0.0  ;;  %v1588_v41 = vmul.f32 %v645_v31, %v1461_v15 }
 0x1a3   : > { %650 = vrot.lane.b32.xlu0 %v646_v37, %s1215_s13  ;;  %v1585_v40 = vmul.f32 %v646_v37, %v1471_v20  ;;  %v1224_v20 = vmov 1  }
 0x1a4   : > { %v1591_v12 = vmul.f32 %v647_v38, %v1461_v15  ;;  %v1202_v15 = vld [vmem:[%s1789_s3 + $0x4] ss:$8 sps:$4 sm:$0xff]   ;;  %1193 = vset.pattern.permute.xlu1 %v1224_v20  ;;  %1194 = vset.pattern.permute.xlu0 %v1224_v20 }
 0x1a5   : > { %664 = vrot.lane.b32.xlu1 %v644_v28, %s1216_s14  ;;  %v788_v13 = vpack.c.bf16 %v1585_v40, %v1582_v39  ;;  %1140 = vmatprep.mubr.msk.bf16.mxu1 %vm597_vm0, %v1202_v15 }
 0x1a6   : > { %v789_v42 = vpack.c.bf16 %v1591_v12, %v1588_v41 }
 0x1a7   : > { %666 = vrot.lane.b32.xlu0 %v646_v37, %s1216_s14 }
 0x1a9   : > { %680 = vrot.lane.b32.xlu1 %v644_v28, %s1217_s15 }
 0x1ab   : > { %682 = vrot.lane.b32.xlu0 %v646_v37, %s1217_s15 }
 0x1ad   : > { %696 = vrot.lane.b32.xlu1 %v644_v28, %s1218_s16 }
 0x1af   : > { %698 = vrot.lane.b32.xlu0 %v646_v37, %s1218_s16 }
 0x1b1   : > { %716 = vrot.lane.b32.xlu1 %v644_v28, %s1219_s17 }
 0x1b3   : > { %718 = vrot.lane.b32.xlu0 %v646_v37, %s1219_s17 }
 0x1b5   : > { %732 = vrot.lane.b32.xlu1 %v644_v28, %s1220_s18 }
 0x1b7   : > { %734 = vrot.lane.b32.xlu0 %v646_v37, %s1220_s18 }
 0x1b9   : > { %748 = vrot.lane.b32.xlu1 %v644_v28, %s1221_s19 }
 0x1bb   : > { %750 = vrot.lane.b32.xlu0 %v646_v37, %s1221_s19 }
 0x1bd   : > { %652 = vrot.lane.b32.xlu1 %v645_v31, %s1215_s13 }
 0x1bf   : > { %654 = vrot.lane.b32.xlu0 %v647_v38, %s1215_s13 }
 0x1c1   : > { %668 = vrot.lane.b32.xlu1 %v645_v31, %s1216_s14 }
 0x1c3   : > { %670 = vrot.lane.b32.xlu0 %v647_v38, %s1216_s14 }
 0x1c5   : > { %684 = vrot.lane.b32.xlu1 %v645_v31, %s1217_s15 }
 0x1c7   : > { %686 = vrot.lane.b32.xlu0 %v647_v38, %s1217_s15 }
 0x1c9   : > { %700 = vrot.lane.b32.xlu1 %v645_v31, %s1218_s16 }
 0x1cb   : > { %702 = vrot.lane.b32.xlu0 %v647_v38, %s1218_s16 }
 0x1cd   : > { %764 = vrot.lane.b32.xlu1 %v644_v28, %s1222_s22 }
 0x1cf   : > { %766 = vrot.lane.b32.xlu0 %v646_v37, %s1222_s22 }
 0x1d1   : > { %720 = vrot.lane.b32.xlu1 %v645_v31, %s1219_s17 }
 0x1d3   : > { %722 = vrot.lane.b32.xlu0 %v647_v38, %s1219_s17 }
 0x1d5   : > { %736 = vrot.lane.b32.xlu1 %v645_v31, %s1220_s18 }
 0x1d7   : > { %738 = vrot.lane.b32.xlu0 %v647_v38, %s1220_s18 }
 0x1d9   : > { %752 = vrot.lane.b32.xlu1 %v645_v31, %s1221_s19 }
 0x1db   : > { %754 = vrot.lane.b32.xlu0 %v647_v38, %s1221_s19 }
 0x1dd   : > { %768 = vrot.lane.b32.xlu1 %v645_v31, %s1222_s22 }
 0x1df   : > { %770 = vrot.lane.b32.xlu0 %v647_v38, %s1222_s22 }
 0x1e1   : > { %801 = vperm.xlu1 %1193, %v1375_v6  }
 0x1e3   : > { %805 = vperm.xlu0 %1194, %v1380_v7  }
 0x1e5   : > { %1195 = vset.pattern.permute.xlu1 %v1223_v5 }
 0x1e7   : > { %1196 = vset.pattern.permute.xlu0 %v1223_v5 }
 0x213   : > { %v649_v45 = vpop.permute.xlu1 %648 }
 0x215   : > { %v651_v46 = vpop.permute.xlu0 %650 }
 0x217   : > { %v665_v47 = vpop.permute.xlu1 %664 }
 0x219   : > { %v667_v48 = vpop.permute.xlu0 %666 }
 0x21b   : > { %v681_v49 = vpop.permute.xlu1 %680 }
 0x21d   : > { %v683_v54 = vpop.permute.xlu0 %682 }
 0x21f   : > { %v697_v55 = vpop.permute.xlu1 %696 }
 0x221   : > { %v699_v56 = vpop.permute.xlu0 %698 }
 0x223   : > { %v1635_v57 = vpop.permute.xlu1 %716 }
 0x225   : > { %v1637_v58 = vpop.permute.xlu0 %718 }
 0x227   : > { %v1639_v59 = vpop.permute.xlu1 %732 }
 0x229   : > { %v1641_v6 = vpop.permute.xlu0 %734 }
 0x22b   : > { %v1643_v7 = vpop.permute.xlu1 %748 }
 0x22d   : > { %v1645_v60 = vpop.permute.xlu0 %750 }
 0x22f   : > { %v653_v5 = vpop.permute.xlu1 %652 }
 0x230   : > { %v656_v61 = vsel %vm354_vm1, %v649_v45, %v653_v5  ;;  %v658_v62 = vsel %vm354_vm1, %v653_v5, %v649_v45 }
 0x231   : > { %v655_v8 = vpop.permute.xlu0 %654  ;;  %v660_v21 = vmul.f32 %v658_v62, %v1401_v16  ;;  %v661_v24 = vmul.f32 %v656_v61, %v1404_v17 }
 0x232   : > { %v657_v11 = vsel %vm354_vm1, %v651_v46, %v655_v8  ;;  %v659_v14 = vsel %vm354_vm1, %v655_v8, %v651_v46 }
 0x233   : > { %v662_v22 = vmul.f32 %v659_v14, %v1401_v16  ;;  %v669_v23 = vpop.permute.xlu1 %668  ;;  %v663_v25 = vmul.f32 %v657_v11, %v1404_v17 }
 0x234   : > { %v672_v26 = vsel %vm379_vm2, %v665_v47, %v669_v23  ;;  %v674_v27 = vsel %vm379_vm2, %v669_v23, %v665_v47 }
 0x235   : > { %v671_v9 = vpop.permute.xlu0 %670  ;;  %v781_v28 = vpack.c.bf16 %v663_v25, %v661_v24  ;;  %v780_v29 = vpack.c.bf16 %v662_v22, %v660_v21  ;;  %v676_v31 = vmul.f32 %v674_v27, %v1421_v33  ;;  %v677_v36 = vmul.f32 %v672_v26, %v1424_v34 }
 0x236   : > { %v673_v30 = vsel %vm379_vm2, %v667_v48, %v671_v9  ;;  %v675_v16 = vsel %vm379_vm2, %v671_v9, %v667_v48 }
 0x237   : > { %v678_v17 = vmul.f32 %v675_v16, %v1421_v33  ;;  %v679_v37 = vmul.f32 %v673_v30, %v1424_v34  ;;  %820 = vmatprep.subr.bf16.mxu1 %v781_v28  ;;  %v685_v38 = vpop.permute.xlu1 %684 }
 0x238   : > { %v688_v15 = vsel %vm404_vm3, %v681_v49, %v685_v38  ;;  %v690_v20 = vsel %vm404_vm3, %v685_v38, %v681_v49  ;;  %821 = vmatpush1.bf16.msra.mxu1 %v780_v29 }
 0x239   : > { %v687_v45 = vpop.permute.xlu0 %686  ;;  %v783_v46 = vpack.c.bf16 %v679_v37, %v677_v36  ;;  %v782_v47 = vpack.c.bf16 %v678_v17, %v676_v31  ;;  %v692_v34 = vmul.f32 %v690_v20, %v1441_v50  ;;  %v693_v5 = vmul.f32 %v688_v15, %v1444_v51 }
 0x23a   : > { %v689_v48 = vsel %vm404_vm3, %v683_v54, %v687_v45  ;;  %v691_v33 = vsel %vm404_vm3, %v687_v45, %v683_v54 }
 0x23b   : > { %v694_v61 = vmul.f32 %v691_v33, %v1441_v50  ;;  %v695_v62 = vmul.f32 %v689_v48, %v1444_v51  ;;  %822 = vmatprep.subr.bf16.mxu1 %v783_v46  ;;  %v701_v49 = vpop.permute.xlu1 %700 }
 0x23c   : > { %v704_v8 = vsel %vm429_vm4, %v697_v55, %v701_v49  ;;  %v706_v11 = vsel %vm429_vm4, %v701_v49, %v697_v55  ;;  %823 = vmatpush1.bf16.msra.mxu1 %v782_v47 }
 0x23d   : > { %v703_v14 = vpop.permute.xlu0 %702  ;;  %v785_v21 = vpack.c.bf16 %v695_v62, %v693_v5  ;;  %v784_v54 = vpack.c.bf16 %v694_v61, %v692_v34  ;;  %v708_v51 = vmul.f32 %v706_v11, %v1465_v18  ;;  %v709_v23 = vmul.f32 %v704_v8, %v1468_v19 }
 0x23e   : > { %v705_v22 = vsel %vm429_vm4, %v699_v56, %v703_v14  ;;  %v707_v50 = vsel %vm429_vm4, %v703_v14, %v699_v56 }
 0x23f   : > { %v710_v24 = vmul.f32 %v707_v50, %v1465_v18  ;;  %v711_v25 = vmul.f32 %v705_v22, %v1468_v19  ;;  %824 = vmatprep.subr.bf16.mxu1 %v785_v21  ;;  %v765_v55 = vpop.permute.xlu1 %764  ;;  %v1200_v50 = vld [vmem:[%s1789_s3] ss:$8 sps:$4 sm:$0xff]  }
 0x240   : > { %825 = vmatpush1.bf16.msra.mxu1 %v784_v54 }
 0x241   : > { %v767_v26 = vpop.permute.xlu0 %766  ;;  %v787_v27 = vpack.c.bf16 %v711_v25, %v709_v23  ;;  %v786_v9 = vpack.c.bf16 %v710_v24, %v708_v51 }
 0x243   : > { %826 = vmatprep.subr.bf16.mxu1 %v787_v27  ;;  %v721_v28 = vpop.permute.xlu1 %720 }
 0x244   : > { %v724_v56 = vsel %vm466_vm5, %v1635_v57, %v721_v28  ;;  %v726_v29 = vsel %vm466_vm5, %v721_v28, %v1635_v57  ;;  %827 = vmatpush1.bf16.msra.mxu1 %v786_v9 }
 0x245   : > { %v723_v18 = vpop.permute.xlu0 %722  ;;  %828 = vmatprep.subr.bf16.mxu1 %v789_v42  ;;  %v728_v16 = vmul.f32 %v724_v56, %v1496_v43  ;;  %v729_v31 = vmul.f32 %v726_v29, %v1499_v44  ;;  %v1225_v56 = vmov 0.0|0.0   ;;  %v1227_v29 = vmov 0.0  }
 0x246   : > { %v725_v19 = vsel %vm466_vm5, %v1637_v58, %v723_v18  ;;  %v727_v30 = vsel %vm466_vm5, %v723_v18, %v1637_v58  ;;  %1167 = vmatprep.subr.bf16.mxu0 %v1225_v56  ;;  %1159 = vmatprep.mubr.msk.f32.mxu0 %vm1226_vm9, %v1227_v29 }
 0x247   : > { %v730_v57 = vmul.f32 %v725_v19, %v1496_v43  ;;  %v731_v36 = vmul.f32 %v727_v30, %v1499_v44  ;;  %v737_v17 = vpop.permute.xlu1 %736 }
 0x248   : > { %v740_v41 = vsel %vm491_vm6, %v1639_v59, %v737_v17  ;;  %v742_v12 = vsel %vm491_vm6, %v737_v17, %v1639_v59  ;;  %829 = vmatpush1.bf16.msra.mxu1 %v788_v13 }
 0x249   : > { %v739_v42 = vpop.permute.xlu0 %738  ;;  %v791_v58 = vpack.c.bf16 %v731_v36, %v729_v31  ;;  %v790_v37 = vpack.c.bf16 %v730_v57, %v728_v16  ;;  %v744_v38 = vmul.f32 %v740_v41, %v1516_v63  ;;  %v745_v15 = vmul.f32 %v742_v12, %v1519_v4  ;;  %v872_v57 = vld [vmem:[%s1791_s5] sm:$0xf] }
 0x24a   : > { %v741_v43 = vsel %vm491_vm6, %v1641_v6, %v739_v42  ;;  %v743_v44 = vsel %vm491_vm6, %v739_v42, %v1641_v6  ;;  %v947_v36 = vld [vmem:[%s1792_s6] sm:$0xff]  ;;  %v948_v42 = vld [vmem:[%s1792_s6 + $0x8] sm:$0xff] }
 0x24b   : > { %v746_v59 = vmul.f32 %v741_v43, %v1516_v63  ;;  %v747_v39 = vmul.f32 %v743_v44, %v1519_v4  ;;  %v753_v40 = vpop.permute.xlu1 %752  ;;  %830 = vmatprep.subr.bf16.mxu1 %v791_v58 }
 0x24c   : > { %v756_v13 = vsel %vm516_vm7, %v1643_v7, %v753_v40  ;;  %v758_v20 = vsel %vm516_vm7, %v753_v40, %v1643_v7  ;;  %831 = vmatpush1.bf16.msra.mxu1 %v790_v37 }
 0x24d   : > { %v755_v6 = vpop.permute.xlu0 %754  ;;  %v793_v45 = vpack.c.bf16 %v747_v39, %v745_v15  ;;  %v792_v46 = vpack.c.bf16 %v746_v59, %v744_v38  ;;  %v760_v47 = vmul.f32 %v756_v13, %v1536_v32  ;;  %v761_v48 = vmul.f32 %v758_v20, %v1539_v35 }
 0x24e   : > { %v757_v63 = vsel %vm516_vm7, %v1645_v60, %v755_v6  ;;  %v759_v4 = vsel %vm516_vm7, %v755_v6, %v1645_v60 }
 0x24f   : > { %v762_v33 = vmul.f32 %v757_v63, %v1536_v32  ;;  %v763_v7 = vmul.f32 %v759_v4, %v1539_v35  ;;  %v769_v34 = vpop.permute.xlu1 %768  ;;  %832 = vmatprep.subr.bf16.mxu1 %v793_v45 }
 0x250   : > { %v772_v5 = vsel %vm541_vm8, %v765_v55, %v769_v34  ;;  %v774_v61 = vsel %vm541_vm8, %v769_v34, %v765_v55  ;;  %833 = vmatpush1.bf16.msra.mxu1 %v792_v46 }
 0x251   : > { %v771_v62 = vpop.permute.xlu0 %770  ;;  %v795_v49 = vpack.c.bf16 %v763_v7, %v761_v48  ;;  %v794_v60 = vpack.c.bf16 %v762_v33, %v760_v47  ;;  %v776_v35 = vmul.f32 %v1557_v52, %v772_v5  ;;  %v777_v11 = vmul.f32 %v1562_v53, %v774_v61 }
 0x252   : > { %v773_v8 = vsel %vm541_vm8, %v767_v26, %v771_v62  ;;  %v775_v32 = vsel %vm541_vm8, %v771_v62, %v767_v26 }
 0x253   : > { %v778_v14 = vmul.f32 %v1557_v52, %v773_v8  ;;  %v779_v21 = vmul.f32 %v1562_v53, %v775_v32  ;;  %834 = vmatprep.subr.bf16.mxu1 %v795_v49 }
 0x254   : > { %835 = vmatpush1.bf16.msra.mxu1 %v794_v60 }
 0x255   : > { %v797_v54 = vpack.c.bf16 %v779_v21, %v777_v11  ;;  %v796_v22 = vpack.c.bf16 %v778_v14, %v776_v35 }
 0x257   : > { %836 = vmatprep.subr.bf16.mxu1 %v797_v54 }
 0x258   : > { %837 = vmatpush1.bf16.msra.mxu1 %v796_v22 }
 0x25b   : > { %853 = vmatmul.mubr.bf16.vlgmr.msra.gmra.mrb[0].mxu1 %v1200_v50 }
 0x25c   : > { %1164 = vmatprep.mubr.msk.f32.mxu1 %vm949_vm10, %v947_v36 }
 0x260   : > { %v802_v10 = vpop.permute.xlu1 %801 }
 0x262   : > { %v806_v23 = vpop.permute.xlu0 %805 }
 0x32e   : > { %v854_v51 = vpop.f32.mrb[0].mxu1 }
 0x32f   : > { %v855_v24 = vadd.f32 %v854_v51, %v802_v10  ;;  %v856_v25 = vpop.f32.mrb[1].mxu1 }
 0x330   : > { %v857_v55 = vadd.f32 %v856_v25, %v802_v10  ;;  %v858_v52 = vpop.f32.mrb[2].mxu1 }
 0x331   : > { %v859_v26 = vadd.f32 %v858_v52, %v806_v23  ;;  %v860_v53 = vpop.f32.mrb[3].mxu1 }
 0x332   : > { %v861_v27 = vadd.f32 %v860_v53, %v806_v23  ;;  %v863_v9 = vadd.f32 %v857_v55, %v855_v24 }
 0x334   : > { %864 = vadd.xlane.f32.xlu1 %v863_v9  ;;  %v866_v28 = vadd.f32 %v861_v27, %v859_v26 }
 0x336   : > { %867 = vadd.xlane.f32.xlu0 %v866_v28 }
 0x3c1   : > { %v865_v18 = vpop.xlane.xlu1 %864 }
 0x3c2   : > { %v870_v30 = vmul.f32 0.00390625, %v865_v18 }
 0x3c3   : > { %v868_v19 = vpop.xlane.xlu0 %867 }
 0x3c4   : > { %v871_v16 = vmul.f32 0.00390625, %v868_v19 }
 0x3c6   : > { %v1168_v31 = vpack.c.bf16 %v871_v16, %v870_v30 }
 0x3c8   : > { %1169 = vmatpush3.bf16.msra.mxu0 %v1168_v31 }
 0x3cb   : > { %1160 = vmatmul.mubr.msk.f32.vlgmr.msra.gmra.mrb[4].mxu0 %vm597_vm0, %v872_v57 }
 0x49e   : > { %v942_v17 = vpop.f32.mrb[4].mxu0 }
 0x49f   : > { %v946_v41 = vmax.f32 %v942_v17, 0.0  ;;  %v1161_v12 = vpop.f32.mrb[5].mxu0 }
 0x4a1   : > { %1162 = vmatprep.subr.msk.mxu1 %vm956_vm11, %v946_v41 }
 0x4a2   : > { %1163 = vmatpush3.msk.msra.mxu1 %vm956_vm11, %v946_v41 }
 0x4a3   : > { %1165 = vmatmul.mubr.msk.f32.vlgmr.msra.gmra.mrb[4].mxu1 %vm949_vm10, %v948_v42 }
 0x576   : > { %v1166_v58 = vpop.f32.mrb[4].mxu1 }
 0x577   : > { %v1036_v37 = vmul.f32 0.5, %v1166_v58  ;;  %v1026_v43 = vpop.f32.mrb[5].mxu1 }
 0x578   : > { %v1035_v44 = vmul.f32 0.5, %v1026_v43 }
 0x579   : > { %1203 = vtanh.f32 %v1036_v37 }
 0x57a   : > { %1205 = vtanh.f32 %v1035_v44 }
 0x583   : > { %v1204_v38 = vpop.eup %1203 }
 0x584   : > { %v1206_v15 = vpop.eup %1205  ;;  %v1040_v59 = vadd.f32 1.0, %v1204_v38 }
 0x585   : > { %v1039_v39 = vadd.f32 1.0, %v1206_v15 }
 0x586   : > { %v1042_v40 = vmul.f32 0.5, %v1040_v59 }
 0x587   : > { %v1041_v13 = vmul.f32 0.5, %v1039_v39 }
 0x588   : > { %1050 = vperm.xlu0 %1196, %v1042_v40  }
 0x589   : > { %1045 = vperm.xlu1 %1195, %v1041_v13  }
 0x607   : > { %v1051_v20 = vpop.permute.xlu0 %1050 }
 0x608   : > { %v1055_v6 = vmul.f32 %v1051_v20, %v859_v26  ;;  %v1056_v45 = vmul.f32 %v1051_v20, %v861_v27  ;;  %v1046_v46 = vpop.permute.xlu1 %1045 }
 0x609   : > { %v1053_v63 = vmul.f32 %v1046_v46, %v855_v24  ;;  %v1054_v4 = vmul.f32 %v1046_v46, %v857_v55 }
 0x60a   : > { %v1059_v47 = vadd.f32 %v1055_v6, %v1304_v3  ;;  %v1060_v48 = vadd.f32 %v1056_v45, %v1302_v2 }
 0x60b   : > { %v1057_v33 = vadd.f32 %v1053_v63, %v1296_v1  ;;  %v1058_v7 = vadd.f32 %v1054_v4, %v1294_v0 }
 0x60c   : > { %v1063_v34 = vmax.f32 %v1059_v47, 0.0  ;;  %v1064_v5 = vmax.f32 %v1060_v48, 0.0 }
 0x60d   : > { %v1061_v61 = vmax.f32 %v1057_v33, 0.0  ;;  %v1062_v62 = vmax.f32 %v1058_v7, 0.0 }
 0x60e   : > { %1067 = vst [vmem:[%s332_s29 + $0x10] sm:$0xff] %v1063_v34  ;;  %1068 = vst [vmem:[%s332_s29 + $0x18] sm:$0xff] %v1064_v5 }
 0x60f   : > { %1065 = vst [vmem:[%s332_s29] sm:$0xff] %v1061_v61  ;;  %1066 = vst [vmem:[%s332_s29 + $0x8] sm:$0xff] %v1062_v62 }
 0x610 PF: > { %s19_s30 = sadd.s32 1, %s1213_s30  }
 0x611   : > { %p16_p4 = scmp.ge.s32.totalorder %s19_s30, 4  }
 0x613   :  { %18 = sbr.rel (!%p16_p4) target bundleno = 1 (0x1), region = 86 }

</bundles_post_ra>
